<compile_context>
chip_gen: v6e
topology: v6e:2x2x1
jax: 0.10.0
libtpu: 0.0.40
codegen_flags: <defaults>
</compile_context>

<pallas_src>
import jax
import jax.numpy as jnp
from jax import lax
from jax.experimental import pallas as pl
from jax.experimental.pallas import tpu as pltpu

_GROUP = 11 * 11               # 121 elements reduced per output group
_LANES = 128                   # groups packed per row (lcm alignment: 121*128)
_PACK = _GROUP * _LANES        # 15488 elements per packed row
_NK = 11                       # K-chunks per packed row
_KCHUNK = _PACK // _NK         # 1408 = 11*128, lane-aligned chunk
_SB_MAX = 128                  # packed rows per block (~7.6 MiB f32 per buffer)


def _seg_sum_kernel(x_ref, s_ref, o_ref):
    # x_ref: (SB, 15488) input block, s_ref: (15488, 128) bf16 selection
    # matrix (constant index_map -> fetched once per core), o_ref: (SB, 128).
    sb = o_ref.shape[0]

    def chunk(k, acc):
        off = pl.multiple_of(k * _KCHUNK, 128)            # lane-aligned slice
        xk = x_ref[:, pl.ds(off, _KCHUNK)].astype(jnp.float32)
        sk = s_ref[pl.ds(off, _KCHUNK), :]
        # Exact f32 segmented sum via 3-way bf16 split: xk ~= hi + mid + lo
        # (error ~2^-26 rel); S is 0/1 so every MXU product is exact and the
        # f32 accumulation reproduces the f32 sum.
        hi = xk.astype(jnp.bfloat16)
        r1 = xk - hi.astype(jnp.float32)
        mid = r1.astype(jnp.bfloat16)
        lo = (r1 - mid.astype(jnp.float32)).astype(jnp.bfloat16)
        acc = acc + jnp.dot(hi, sk, preferred_element_type=jnp.float32)
        acc = acc + jnp.dot(mid, sk, preferred_element_type=jnp.float32)
        acc = acc + jnp.dot(lo, sk, preferred_element_type=jnp.float32)
        return acc

    acc = lax.fori_loop(0, _NK, chunk, jnp.zeros((sb, _LANES), jnp.float32))
    # Fold the pointwise (x + x) into a single scalar multiply of the sums.
    o_ref[...] = (2.0 * acc).astype(o_ref.dtype)


def _selection_matrix():
    # S[e, j] = 1 iff element e of a packed row belongs to group j (e//121==j).
    e = lax.broadcasted_iota(jnp.int32, (_PACK, _LANES), 0)
    j = lax.broadcasted_iota(jnp.int32, (_PACK, _LANES), 1)
    return (e // _GROUP == j).astype(jnp.bfloat16)


def _model_forward(x):
    """Corrected torch semantics: flatten, regroup into (G, 11, 11), double,
    sum over dims (1, 2) with keepdim.  Returns (G, 1, 1), G = x.size // 121."""
    flat = x.reshape(-1)
    total = flat.shape[0]
    if total % _GROUP != 0:
        raise ValueError("element count must be a multiple of 121")
    g = total // _GROUP

    nb = -(-g // _LANES)                    # packed rows (128 groups each)
    gp = nb * _LANES
    pad = gp * _GROUP - total
    if pad:
        # Zero padding -> padded groups sum to 0 and are sliced off below.
        flat = jnp.pad(flat, (0, pad))
    packed = flat.reshape(nb, _PACK)        # lane-dense: 15488 % 128 == 0

    sel = _selection_matrix()               # (15488, 128) bf16, ~3.8 MiB

    sb = nb if nb <= _SB_MAX else _SB_MAX   # full dim or multiple of 8
    nblocks = -(-nb // sb)

    itemsize = jnp.dtype(packed.dtype).itemsize
    cost = pl.CostEstimate(
        flops=6 * nb * _PACK * _LANES,      # 3 MXU passes x 2 flops/MAC
        transcendentals=0,
        bytes_accessed=nb * _PACK * itemsize + _PACK * _LANES * 2
        + nb * _LANES * 4,
    )

    out2d = pl.pallas_call(
        _seg_sum_kernel,
        out_shape=jax.ShapeDtypeStruct((nb, _LANES), jnp.float32),
        grid_spec=pltpu.PrefetchScalarGridSpec(
            num_scalar_prefetch=0,
            grid=(nblocks,),
            in_specs=[
                pl.BlockSpec((sb, _PACK), lambda i: (i, 0)),
                pl.BlockSpec((_PACK, _LANES), lambda i: (0, 0)),  # resident S
            ],
            out_specs=pl.BlockSpec((sb, _LANES), lambda i: (i, 0)),
        ),
        compiler_params=pltpu.CompilerParams(
            dimension_semantics=("parallel",),
            vmem_limit_bytes=40 * 1024 * 1024,
        ),
        cost_estimate=cost,
    )(packed, sel)

    # Lane-dense (nb, 128) -> flat groups; drop the zero-padded tail groups.
    out = out2d.reshape(gp)[:g]
    return out.astype(x.dtype).reshape(g, 1, 1)


model_forward = jax.jit(_model_forward)


def _reference(x):
    flat = x.reshape(-1)
    g = flat.shape[0] // _GROUP
    grouped = flat.reshape(g, 11, 11)
    return jnp.sum(grouped + grouped, axis=(1, 2), keepdims=True)


if __name__ == "__main__":
    key = jax.random.PRNGKey(0)
    k1, k2 = jax.random.split(key)

    # Small input consistent with the module (element count divisible by 121):
    # (2, 11, 22, 11) -> 5324 elements -> G = 44 groups of 11x11.
    # Exercises the zero-padding path (44 groups padded up to 128).
    x1 = jax.random.normal(k1, (2, 11, 22, 11), dtype=jnp.float32)
    out1 = model_forward(x1)
    jax.block_until_ready(out1)
    ref1 = _reference(x1)
    assert out1.shape == ref1.shape == (44, 1, 1)
    assert jnp.allclose(out1, ref1, rtol=1e-5, atol=1e-4)

    # Larger input exercising the multi-block grid and the partial tail block
    # (G = 16896 groups -> 132 packed rows -> 2 grid blocks, second partial).
    x2 = jax.random.normal(k2, (1, 132, 121, 128), dtype=jnp.float32)
    out2 = model_forward(x2)
    jax.block_until_ready(out2)
    ref2 = _reference(x2)
    assert out2.shape == ref2.shape == (16896, 1, 1)
    assert jnp.allclose(out2, ref2, rtol=1e-5, atol=1e-4)

    print("KERNEL_OK")
</pallas_src>

<mosaic_0001>
module attributes {stable_mosaic.version = 11 : i64} {
  func.func @_seg_sum_kernel(%arg0: i32, %arg1: memref<1x15488xf32, #tpu.memory_space<vmem>>, %arg2: memref<15488x128xbf16, #tpu.memory_space<vmem>>, %arg3: memref<1x128xf32, #tpu.memory_space<vmem>>) attributes {dimension_semantics = [#tpu.dimension_semantics<parallel>], iteration_bounds = array<i64: 1>, scalar_prefetch = 0 : i64, scratch_operands = 0 : i64, tpu.core_type = #tpu.core_type<tc>, window_params = [{transform_indices = @transform_0, window_bounds = array<i64: 1, 15488>}, {pipeline_mode = #tpu.pipeline_mode<synchronous>, transform_indices = @transform_1, window_bounds = array<i64: 15488, 128>}, {transform_indices = @transform_2, window_bounds = array<i64: 1, 128>}]} {
    %cst = arith.constant 0.000000e+00 : f32
    %0 = vector.broadcast %cst : f32 to vector<1x128xf32>
    %c0_i32 = arith.constant 0 : i32
    %c11_i32 = arith.constant 11 : i32
    %1 = arith.addi %c0_i32, %c11_i32 : i32
    %c1_i32 = arith.constant 1 : i32
    %2 = scf.for %arg4 = %c0_i32 to %1 step %c1_i32 iter_args(%arg5 = %0) -> (vector<1x128xf32>)  : i32 {
      %c1408_i32 = arith.constant 1408 : i32
      %6 = arith.muli %arg4, %c1408_i32 : i32
      %7 = tpu.assume_multiple %6, 128 : i32
      %c0_3 = arith.constant 0 : index
      %8 = arith.index_cast %7 : i32 to index
      %9 = vector.load %arg1[%c0_3, %8] : memref<1x15488xf32, #tpu.memory_space<vmem>>, vector<1x1408xf32>
      %10 = arith.index_cast %7 : i32 to index
      %c0_4 = arith.constant 0 : index
      %11 = vector.load %arg2[%10, %c0_4] : memref<15488x128xbf16, #tpu.memory_space<vmem>>, vector<1408x128xbf16>
      %12 = arith.truncf %9 : vector<1x1408xf32> to vector<1x1408xbf16>
      %13 = arith.extf %12 : vector<1x1408xbf16> to vector<1x1408xf32>
      %14 = arith.subf %9, %13 : vector<1x1408xf32>
      %15 = arith.truncf %14 : vector<1x1408xf32> to vector<1x1408xbf16>
      %16 = arith.extf %15 : vector<1x1408xbf16> to vector<1x1408xf32>
      %17 = arith.subf %14, %16 : vector<1x1408xf32>
      %18 = arith.truncf %17 : vector<1x1408xf32> to vector<1x1408xbf16>
      %cst_5 = arith.constant dense<0.000000e+00> : vector<1x128xf32>
      %19 = tpu.matmul %12, %11, %cst_5 {dimension_numbers = #tpu.dot_dimension_numbers<[1], [0], [0], [1], [0, 0, 1, 1], [], []>} : vector<1x1408xbf16>, vector<1408x128xbf16>, vector<1x128xf32> -> vector<1x128xf32>
      %20 = arith.addf %arg5, %19 : vector<1x128xf32>
      %cst_6 = arith.constant dense<0.000000e+00> : vector<1x128xf32>
      %21 = tpu.matmul %15, %11, %cst_6 {dimension_numbers = #tpu.dot_dimension_numbers<[1], [0], [0], [1], [0, 0, 1, 1], [], []>} : vector<1x1408xbf16>, vector<1408x128xbf16>, vector<1x128xf32> -> vector<1x128xf32>
      %22 = arith.addf %20, %21 : vector<1x128xf32>
      %cst_7 = arith.constant dense<0.000000e+00> : vector<1x128xf32>
      %23 = tpu.matmul %18, %11, %cst_7 {dimension_numbers = #tpu.dot_dimension_numbers<[1], [0], [0], [1], [0, 0, 1, 1], [], []>} : vector<1x1408xbf16>, vector<1408x128xbf16>, vector<1x128xf32> -> vector<1x128xf32>
      %24 = arith.addf %22, %23 : vector<1x128xf32>
      scf.yield %24 : vector<1x128xf32>
    }
    %c11_i32_0 = arith.constant 11 : i32
    %cst_1 = arith.constant 2.000000e+00 : f32
    %3 = vector.broadcast %cst_1 : f32 to vector<1x128xf32>
    %4 = arith.mulf %3, %2 : vector<1x128xf32>
    %c0 = arith.constant 0 : index
    %c0_2 = arith.constant 0 : index
    %5 = vector.load %arg3[%c0, %c0_2] : memref<1x128xf32, #tpu.memory_space<vmem>>, vector<1x128xf32>
    tpu.vector_store %arg3[%c0, %c0_2], %4 {strides = array<i32>} : memref<1x128xf32, #tpu.memory_space<vmem>>, vector<1x128xf32>,
    return
  }
  func.func @transform_0(%arg0: i32) -> (i32, i32) {
    %c0_i32 = arith.constant 0 : i32
    %c0_i32_0 = arith.constant 0 : i32
    return %arg0, %c0_i32 : i32, i32
  }
  func.func @transform_1(%arg0: i32) -> (i32, i32) {
    %c0_i32 = arith.constant 0 : i32
    %c0_i32_0 = arith.constant 0 : i32
    %c0_i32_1 = arith.constant 0 : i32
    return %c0_i32, %c0_i32_0 : i32, i32
  }
  func.func @transform_2(%arg0: i32) -> (i32, i32) {
    %c0_i32 = arith.constant 0 : i32
    %c0_i32_0 = arith.constant 0 : i32
    return %arg0, %c0_i32 : i32, i32
  }
}

</mosaic_0001>

<bundles_post_ra>
// kernel: _model_forward.1
= control target key start
LH: loop header
LB: loop body
LE: loop exit
PB: predicated region body
PF: predicated region fallthrough
CT: control target
= control target key end

     0   :  { %v2531_v0 = vmov 0.0   ;;  %s2533_s9 = smov 0   ;;  %s3297_s0 = inlined_call_operand.vmem [shape: f32[1,15488], index: 0, kind: input, shape index: {}]   ;;  %s3298_s1 = inlined_call_operand.vmem [shape: bf16[15488,128], index: 1, kind: input, shape index: {}]   ;;  %s3299_s2 = inlined_call_operand.vmem [shape: f32[1,128], index: 2, kind: output, shape index: {}]  }
   0x1 LB: > { %3393 = vst [vmem:[#allocation2_spill] sm:$0xff] %v2507_v0  ;;  %v207_v1 = vlaneseq  ;;  %v2513_v2 = vmov 1966171168   ;;  %s19_s10 = smul.u32 1408, %s2511_s9  ;;  %vm2515_vm0 = vmmov 0   ;;  %s17_s9 = sadd.s32 1, %s2511_s9   ;;  %s2511_s9 = sphi %s2533_s9, %s17_s9   ;;  %v2507_v0 = vphi %v2531_v0, %v3526_v0  }
   0x2   : > { %v300_v3 = vunpack.c.l.s4 %v2513_v2  ;;  %p14_p0 = scmp.ge.s32.totalorder %s17_s9, 11  }
   0x3   : > { %v208_v4 = vshrl.u32 %v207_v1, 7  ;;  %s25_s11 = sshra.s32 %s19_s10, 3  ;;  %s20_s12 = sshra.s32 %s19_s10, 7 }
   0x4   : > { %v301_v5 = vunpack.c.0.s8 %v300_v3  ;;  %s1873_s13 = sshll.u32 %s25_s11, 2  ;;  %s22_s16 = scalar_lea.vmem %s3297_s0, %s20_s12 }
   0x5   : > { %v2542_v6 = vsub.s32 1, %v208_v4  ;;  %v2544_v7 = vsub.s32 3, %v208_v4  ;;  %v2546_v8 = vsub.s32 0, %v208_v4  ;;  %v2548_v9 = vsub.s32 2, %v208_v4  ;;  %s2562_s19 = scalar_lea.vmem %s3298_s1, %s1873_s13  ;;  %v2564_v13 = vld [vmem:[%s22_s16] sm:$0xff] }
   0x6   : > { %v2553_v10 = vsub.s32 5, %v208_v4  ;;  %v2555_v11 = vsub.s32 7, %v208_v4  ;;  %v2557_v12 = vsub.s32 4, %v208_v4  ;;  %v2566_v14 = vsub.s32 %v301_v5, %v208_v4  ;;  %v2571_v16 = vld [vmem:[%s2562_s19 + $0x78] sm:$0xff]   ;;  %v2592_v26 = vld [vmem:[%s22_s16 + $0x8] sm:$0x7] }
   0x7   : > { %v2568_v15 = vsub.s32 6, %v208_v4  ;;  %v214_v17 = vrot.slane %v2564_v13, %v2542_v6  ;;  %v222_v18 = vrot.slane %v2564_v13, %v2544_v7  ;;  %v210_v19 = vrot.slane %v2564_v13, %v2546_v8  ;;  %v2582_v21 = vld [vmem:[%s2562_s19 + $0xf8] sm:$0xff]   ;;  %1962 = vmatprep.subr.bf16.mxu0 %v2571_v16  ;;  %v2616_v37 = vld [vmem:[%s2562_s19 + $0x70] sm:$0xff]   ;;  %v2644_v56 = vld [vmem:[%s2562_s19 + $0x68] sm:$0xff]  }
   0x8   : > { %3394 = vst [vmem:[#allocation3_spill] sm:$0xff] %v2557_v12  ;;  %3395 = vst [vmem:[#allocation4_spill] sm:$0xff] %v2566_v14  ;;  %v218_v20 = vrot.slane %v2564_v13, %v2548_v9  ;;  %v230_v22 = vrot.slane %v2564_v13, %v2553_v10  ;;  %v238_v23 = vrot.slane %v2564_v13, %v2555_v11  ;;  %v2596_v27 = vld [vmem:[%s2562_s19 + $0x38] sm:$0xff]   ;;  %1984 = vmatprep.subr.bf16.mxu1 %v2582_v21  ;;  %v2622_v42 = vld [vmem:[%s2562_s19 + $0xf0] sm:$0xff]  }
   0x9   : > { %3396 = vst [vmem:[#allocation5_spill] sm:$0xff] %v2568_v15  ;;  %v226_v24 = vrot.slane %v2564_v13, %v2557_v12  ;;  %v234_v25 = vrot.slane %v2564_v13, %v2568_v15  ;;  %v263_v28 = vpack.c.bf16 %v214_v17, %v214_v17  ;;  %v265_v29 = vpack.c.bf16 %v222_v18, %v222_v18  ;;  %v2604_v32 = vld [vmem:[%s2562_s19 + $0xb8] sm:$0xff]   ;;  %v2630_v47 = vld [vmem:[%s2562_s19 + $0x30] sm:$0xff]   ;;  %v2654_v61 = vld [vmem:[%s2562_s19 + $0xe8] sm:$0xff]  }
   0xa   : > { %v2598_v30 = vpack.c.bf16 %v210_v19, %v210_v19  ;;  %v2600_v31 = vpack.c.bf16 %v218_v20, %v218_v20  ;;  %v2606_v33 = vpack.c.bf16 %v230_v22, %v230_v22  ;;  %v2608_v34 = vpack.c.bf16 %v238_v23, %v238_v23  ;;  %1963 = vmatpush3.bf16.msra.mxu0 %v2596_v27  ;;  %v2638_v52 = vld [vmem:[%s2562_s19 + $0xb0] sm:$0xff]   ;;  %v2662_v2 = vld [vmem:[%s2562_s19 + $0x28] sm:$0xff]   ;;  %v2673_v20 = vld [vmem:[%s2562_s19 + $0x60] sm:$0xff]  }
   0xb   : > { %v2610_v35 = vpack.c.bf16 %v226_v24, %v226_v24  ;;  %v2612_v36 = vpack.c.bf16 %v234_v25, %v234_v25  ;;  %v274_v38 = vunpack.c.l.bf16 %v263_v28  ;;  %1165 = vmatprep.mubr.bf16.mxu0 %v263_v28  ;;  %v276_v39 = vunpack.c.l.bf16 %v265_v29  ;;  %1985 = vmatpush3.bf16.msra.mxu1 %v2604_v32  ;;  %v2668_v17 = vld [vmem:[%s2562_s19 + $0xa8] sm:$0xff]   ;;  %v2678_v24 = vld [vmem:[%s2562_s19 + $0xe0] sm:$0xff]   ;;  %v2830_v12 = vld [vmem:[%s2562_s19 + $0x158] sm:$0xff]  }
   0xc   : > { %v273_v40 = vunpack.c.l.bf16 %v2598_v30  ;;  %v275_v41 = vunpack.c.l.bf16 %v2600_v31  ;;  %1205 = vmatprep.mubr.bf16.mxu1 %v265_v29  ;;  %v278_v43 = vunpack.c.l.bf16 %v2606_v33  ;;  %v280_v44 = vunpack.c.l.bf16 %v2608_v34  ;;  %1964 = vmatprep.subr.bf16.mxu0 %v2616_v37  ;;  %v2684_v29 = vld [vmem:[%s2562_s19 + $0x20] sm:$0xff]   ;;  %3405 = vst [vmem:[#allocation14_spill] sm:$0xff] %v2830_v12 }
   0xd   : > { %v277_v45 = vunpack.c.l.bf16 %v2610_v35  ;;  %v279_v46 = vunpack.c.l.bf16 %v2612_v36  ;;  %v246_v50 = vrot.slane %v2592_v26, %v2542_v6  ;;  %v242_v51 = vrot.slane %v2592_v26, %v2546_v8  ;;  %1986 = vmatprep.subr.bf16.mxu1 %v2622_v42  ;;  %v2822_v0 = vld [vmem:[%s2562_s19 + $0x120] sm:$0xff]  }
   0xe   : > { %v295_v48 = vcombine.low %v273_v40, %v274_v38  ;;  %v296_v49 = vcombine.low %v275_v41, %v276_v39  ;;  %v250_v55 = vrot.slane %v2592_v26, %v2548_v9  ;;  %1965 = vmatpush3.bf16.msra.mxu0 %v2630_v47  ;;  %v2689_v39 = vld [vmem:[%s2562_s19 + $0xa0] sm:$0xff]   ;;  %v2693_v41 = vld [vmem:[%s2562_s19 + $0x58] sm:$0xff]   ;;  %3403 = vst [vmem:[#allocation12_spill] sm:$0xff] %v2822_v0 }
   0xf   : > { %v297_v53 = vcombine.low %v277_v45, %v278_v43  ;;  %v298_v54 = vcombine.low %v279_v46, %v280_v44  ;;  %v2648_v59 = vpack.c.bf16 %v246_v50, %v246_v50  ;;  %v2650_v60 = vpack.c.bf16 %v242_v51, %v242_v51  ;;  %1987 = vmatpush3.bf16.msra.mxu1 %v2638_v52  ;;  %v2699_v44 = vld [vmem:[%s2562_s19 + $0xd8] sm:$0xff]   ;;  %v2722_v50 = vld [vmem:[%s2562_s19 + $0x10] sm:$0xff]   ;;  %v2826_v15 = vld [vmem:[%s2562_s19 + $0x1a0] sm:$0xff]  }
  0x10   : > { %v305_v57 = vrot.slane %v295_v48, %v2566_v14  ;;  %v312_v58 = vrot.slane %v296_v49, %v2566_v14  ;;  %v2658_v1 = vpack.c.bf16 %v250_v55, %v250_v55  ;;  %1966 = vmatprep.subr.bf16.mxu0 %v2644_v56  ;;  %1988 = vmatprep.subr.bf16.mxu1 %v2654_v61  ;;  %v2706_v46 = vld [vmem:[%s2562_s19 + $0x18] sm:$0xff]   ;;  %v2714_v49 = vld [vmem:[%s2562_s19 + $0x50] sm:$0xff]   ;;  %v2738_v55 = vld [vmem:[%s2562_s19 + $0x8] sm:$0xff]  }
  0x11   : > { %v319_v62 = vrot.slane %v297_v53, %v2566_v14  ;;  %v326_v63 = vrot.slane %v298_v54, %v2566_v14  ;;  %v282_v4 = vunpack.c.l.bf16 %v2648_v59  ;;  %v281_v5 = vunpack.c.l.bf16 %v2650_v60  ;;  %v2710_v48 = vld [vmem:[%s2562_s19 + $0x98] sm:$0xff]   ;;  %v2726_v51 = vld [vmem:[%s2562_s19 + $0x90] sm:$0xff]   ;;  %v2730_v53 = vld [vmem:[%s2562_s19 + $0x48] sm:$0xff]   ;;  %3404 = vst [vmem:[#allocation13_spill] sm:$0xff] %v2826_v15 }
  0x12   : > { %v327_v3 = vcombine.low %v305_v57, %v312_v58  ;;  %v283_v19 = vunpack.c.l.bf16 %v2658_v1  ;;  %1967 = vmatpush3.bf16.msra.mxu0 %v2662_v2  ;;  %v2734_v54 = vld [vmem:[%s2562_s19 + $0xc8] sm:$0xff]   ;;  %v2746_v58 = vld [vmem:[%s2562_s19 + $0x40] sm:$0xff]  }
  0x13   : > { %v328_v18 = vcombine.low %v319_v62, %v326_v63  ;;  %v344_v23 = vcombine.low %v281_v5, %v282_v4  ;;  %1989 = vmatpush3.bf16.msra.mxu1 %v2668_v17  ;;  %1968 = vmatprep.subr.bf16.mxu0 %v2673_v20  ;;  %v2742_v57 = vld [vmem:[%s2562_s19 + $0x88] sm:$0xff]   ;;  %v2750_v62 = vld [vmem:[%s2562_s19 + $0xc0] sm:$0xff]   ;;  %v2762_v4 = vld [vmem:[%s2562_s19 + $0x178] sm:$0xff]  }
  0x14   : > { %v335_v22 = vrot.slane %v327_v3, %v2566_v14  ;;  %v358_v28 = vrot.slane %v283_v19, %v2566_v14  ;;  %1990 = vmatprep.subr.bf16.mxu1 %v2678_v24  ;;  %v2754_v63 = vld [vmem:[%s2562_s19] sm:$0xff]   ;;  %v2766_v5 = vld [vmem:[%s2562_s19 + $0x1f8] sm:$0xff]  }
  0x15   : > { %v342_v25 = vrot.slane %v328_v18, %v2566_v14  ;;  %v351_v38 = vrot.slane %v344_v23, %v2566_v14  ;;  %v2758_v3 = vld [vmem:[%s2562_s19 + $0x80] sm:$0xff]   ;;  %v2770_v18 = vld [vmem:[%s2562_s19 + $0x138] sm:$0xff]   ;;  %v2784_v23 = vld [vmem:[%s2562_s19 + $0x1f0] sm:$0xff]  }
  0x16   : > { %1969 = vmatpush3.bf16.msra.mxu0 %v2684_v29  ;;  %v2775_v19 = vld [vmem:[%s2562_s19 + $0x1b8] sm:$0xff]  }
  0x17   : > { %v343_v40 = vcombine.low %v335_v22, %v342_v25  ;;  %v2695_v43 = vcombine.low %v351_v38, %v358_v28  ;;  %1991 = vmatpush3.bf16.msra.mxu1 %v2689_v39  ;;  %1970 = vmatprep.subr.bf16.mxu0 %v2693_v41  ;;  %v2780_v22 = vld [vmem:[%s2562_s19 + $0x170] sm:$0xff]   ;;  %v2798_v25 = vld [vmem:[%s2562_s19 + $0x168] sm:$0xff]   ;;  %v2814_v38 = vld [vmem:[%s2562_s19 + $0x160] sm:$0xff]  }
  0x18   : > { %1992 = vmatprep.subr.bf16.mxu1 %v2699_v44  ;;  %3397 = vst [vmem:[#allocation6_spill] sm:$0xff] %v2798_v25  ;;  %v2806_v28 = vld [vmem:[%s2562_s19 + $0x128] sm:$0xff]   ;;  %3401 = vst [vmem:[#allocation10_spill] sm:$0xff] %v2814_v38 }
  0x19   : > { %v2702_v45 = vsub.f32 %v2564_v13, %v343_v40  ;;  %v2718_v13 = vld [vmem:[%s2562_s19 + $0xd0] sm:$0xff]   ;;  %3399 = vst [vmem:[#allocation8_spill] sm:$0xff] %v2806_v28  ;;  %v2818_v40 = vld [vmem:[%s2562_s19 + $0x1e0] sm:$0xff]  }
  0x1a   : > { %1971 = vmatpush3.bf16.msra.mxu0 %v2706_v46  ;;  %3402 = vst [vmem:[#allocation11_spill] sm:$0xff] %v2818_v40 }
  0x1b   : > { %1993 = vmatpush3.bf16.msra.mxu1 %v2710_v48  ;;  %1972 = vmatprep.subr.bf16.mxu0 %v2714_v49 }
  0x1c   : > { %1994 = vmatprep.subr.bf16.mxu1 %v2718_v13 }
  0x1e   : > { %1973 = vmatpush3.bf16.msra.mxu0 %v2722_v50 }
  0x1f   : > { %1995 = vmatpush3.bf16.msra.mxu1 %v2726_v51  ;;  %1974 = vmatprep.subr.bf16.mxu0 %v2730_v53 }
  0x20   : > { %1996 = vmatprep.subr.bf16.mxu1 %v2734_v54 }
  0x22   : > { %1975 = vmatpush3.bf16.msra.mxu0 %v2738_v55 }
  0x23   : > { %1997 = vmatpush3.bf16.msra.mxu1 %v2742_v57  ;;  %1976 = vmatprep.subr.bf16.mxu0 %v2746_v58 }
  0x24   : > { %1998 = vmatprep.subr.bf16.mxu1 %v2750_v62 }
  0x26   : > { %1977 = vmatpush3.bf16.msra.mxu0 %v2754_v63 }
  0x27   : > { %1999 = vmatpush3.bf16.msra.mxu1 %v2758_v3  ;;  %2006 = vmatprep.subr.bf16.mxu0 %v2762_v4 }
  0x28   : > { %2028 = vmatprep.subr.bf16.mxu1 %v2766_v5 }
  0x29   : > { %1166 = vmatmul.mubr.bf16.vlgmr.msra.gmra.mxu0 %v2598_v30  ;;  %v2789_v30 = vld [vmem:[%s2562_s19 + $0x130] sm:$0xff]  }
  0x2a   : > { %1206 = vmatmul.mubr.bf16.vlgmr.msra.gmra.mxu1 %v2600_v31  ;;  %2007 = vmatpush3.bf16.msra.mxu0 %v2770_v18  ;;  %v2794_v31 = vld [vmem:[%s2562_s19 + $0x1b0] sm:$0xff]  }
  0x2b   : > { %2029 = vmatpush3.bf16.msra.mxu1 %v2775_v19  ;;  %1245 = vmatprep.mubr.bf16.mxu0 %v2606_v33  ;;  %v2802_v33 = vld [vmem:[%s2562_s19 + $0x1e8] sm:$0xff]  }
  0x2c   : > { %2008 = vmatprep.subr.bf16.mxu0 %v2780_v22  ;;  %1285 = vmatprep.mubr.bf16.mxu1 %v2608_v34  ;;  %3398 = vst [vmem:[#allocation7_spill] sm:$0xff] %v2802_v33  ;;  %v2810_v34 = vld [vmem:[%s2562_s19 + $0x1a8] sm:$0xff]  }
  0x2d   : > { %2030 = vmatprep.subr.bf16.mxu1 %v2784_v23  ;;  %3400 = vst [vmem:[#allocation9_spill] sm:$0xff] %v2810_v34 }
  0x2e   : > { %2009 = vmatpush3.bf16.msra.mxu0 %v2789_v30 }
  0x2f   : > { %2031 = vmatpush3.bf16.msra.mxu1 %v2794_v31  ;;  %2010 = vmatprep.subr.bf16.mxu0 %v2798_v25 }
  0x30   : > { %2032 = vmatprep.subr.bf16.mxu1 %v2802_v33 }
  0x32   : > { %2011 = vmatpush3.bf16.msra.mxu0 %v2806_v28  ;;  %v2880_v28 = vld [vmem:[%s2562_s19 + $0x140] sm:$0xff]  }
  0x33   : > { %2033 = vmatpush3.bf16.msra.mxu1 %v2810_v34  ;;  %2012 = vmatprep.subr.bf16.mxu0 %v2814_v38  ;;  %v2834_v34 = vld [vmem:[%s2562_s19 + $0x1d8] sm:$0xff]   ;;  %3417 = vst [vmem:[#allocation26_spill] sm:$0xff] %v2880_v28 }
  0x34   : > { %2034 = vmatprep.subr.bf16.mxu1 %v2818_v40  ;;  %3406 = vst [vmem:[#allocation15_spill] sm:$0xff] %v2834_v34  ;;  %v2838_v38 = vld [vmem:[%s2562_s19 + $0x118] sm:$0xff]  }
  0x35   : > { %3407 = vst [vmem:[#allocation16_spill] sm:$0xff] %v2838_v38  ;;  %v2842_v40 = vld [vmem:[%s2562_s19 + $0x198] sm:$0xff]  }
  0x36   : > { %2013 = vmatpush3.bf16.msra.mxu0 %v2822_v0  ;;  %3408 = vst [vmem:[#allocation17_spill] sm:$0xff] %v2842_v40  ;;  %v2846_v0 = vld [vmem:[%s2562_s19 + $0x150] sm:$0xff]  }
  0x37   : > { %2035 = vmatpush3.bf16.msra.mxu1 %v2826_v15  ;;  %2014 = vmatprep.subr.bf16.mxu0 %v2830_v12  ;;  %3409 = vst [vmem:[#allocation18_spill] sm:$0xff] %v2846_v0  ;;  %v2850_v15 = vld [vmem:[%s2562_s19 + $0x1d0] sm:$0xff]  }
  0x38   : > { %2036 = vmatprep.subr.bf16.mxu1 %v2834_v34  ;;  %3410 = vst [vmem:[#allocation19_spill] sm:$0xff] %v2850_v15  ;;  %v2854_v12 = vld [vmem:[%s2562_s19 + $0x110] sm:$0xff]  }
  0x39   : > { %3411 = vst [vmem:[#allocation20_spill] sm:$0xff] %v2854_v12  ;;  %v2858_v34 = vld [vmem:[%s2562_s19 + $0x190] sm:$0xff]  }
  0x3a   : > { %2015 = vmatpush3.bf16.msra.mxu0 %v2838_v38  ;;  %3412 = vst [vmem:[#allocation21_spill] sm:$0xff] %v2858_v34  ;;  %v2862_v38 = vld [vmem:[%s2562_s19 + $0x148] sm:$0xff]  }
  0x3b   : > { %2037 = vmatpush3.bf16.msra.mxu1 %v2842_v40  ;;  %2016 = vmatprep.subr.bf16.mxu0 %v2846_v0  ;;  %3413 = vst [vmem:[#allocation22_spill] sm:$0xff] %v2862_v38  ;;  %v2866_v40 = vld [vmem:[%s2562_s19 + $0x1c8] sm:$0xff]  }
  0x3c   : > { %2038 = vmatprep.subr.bf16.mxu1 %v2850_v15  ;;  %3414 = vst [vmem:[#allocation23_spill] sm:$0xff] %v2866_v40  ;;  %v2870_v0 = vld [vmem:[%s2562_s19 + $0x108] sm:$0xff]  }
  0x3d   : > { %3415 = vst [vmem:[#allocation24_spill] sm:$0xff] %v2870_v0  ;;  %v2874_v15 = vld [vmem:[%s2562_s19 + $0x188] sm:$0xff]  }
  0x3e   : > { %2017 = vmatpush3.bf16.msra.mxu0 %v2854_v12  ;;  %3416 = vst [vmem:[#allocation25_spill] sm:$0xff] %v2874_v15  ;;  %v366_v12 = vrot.slane %v2695_v43, %v2566_v14  ;;  %v2895_v43 = vld [vmem:[%s2562_s19 + $0x180] sm:$0xff]   ;;  %v2899_v14 = vld [vmem:[%s2562_s19 + $0x278] sm:$0xff]  }
  0x3f   : > { %2039 = vmatpush3.bf16.msra.mxu1 %v2858_v34  ;;  %2018 = vmatprep.subr.bf16.mxu0 %v2862_v38  ;;  %v2884_v34 = vld [vmem:[%s2562_s19 + $0x1c0] sm:$0xff]   ;;  %3420 = vst [vmem:[#allocation29_spill] sm:$0xff] %v2895_v43  ;;  %3421 = vst [vmem:[#allocation30_spill] sm:$0xff] %v2899_v14 }
  0x40   : > { %2040 = vmatprep.subr.bf16.mxu1 %v2866_v40  ;;  %3418 = vst [vmem:[#allocation27_spill] sm:$0xff] %v2884_v34  ;;  %v2887_v38 = vsub.f32 %v2592_v26, %v366_v12  ;;  %v2891_v40 = vld [vmem:[%s2562_s19 + $0x100] sm:$0xff]   ;;  %v3343_v12 = vmov 0.0   ;;  %v2908_v26 = vld [vmem:[%s2562_s19 + $0x2b8] sm:$0xff]  }
  0x41   : > { %3423 = vst [vmem:[#allocation32_spill] sm:$0xff] %v2908_v26 }
  0x42   : > { %2019 = vmatpush3.bf16.msra.mxu0 %v2870_v0  ;;  %3419 = vst [vmem:[#allocation28_spill] sm:$0xff] %v2887_v38  ;;  %v2912_v38 = vld [vmem:[%s2562_s19 + $0x270] sm:$0xff]  }
  0x43   : > { %2041 = vmatpush3.bf16.msra.mxu1 %v2874_v15  ;;  %2020 = vmatprep.subr.bf16.mxu0 %v2880_v28  ;;  %v2903_v15 = vld [vmem:[%s2562_s19 + $0x238] sm:$0xff]   ;;  %3424 = vst [vmem:[#allocation33_spill] sm:$0xff] %v2912_v38 }
  0x44   : > { %2042 = vmatprep.subr.bf16.mxu1 %v2884_v34  ;;  %3422 = vst [vmem:[#allocation31_spill] sm:$0xff] %v2903_v15 }
  0x46   : > { %2021 = vmatpush3.bf16.msra.mxu0 %v2891_v40 }
  0x47   : > { %2043 = vmatpush3.bf16.msra.mxu1 %v2895_v43  ;;  %2050 = vmatprep.subr.bf16.mxu0 %v2899_v14  ;;  %v2917_v43 = vld [vmem:[%s2562_s19 + $0x230] sm:$0xff]   ;;  %v3427_v14 = vmov 0.0  }
  0x48   : > { %2319 = vmatprep.subr.bf16.mxu1 %v3343_v12  ;;  %3425 = vst [vmem:[#allocation34_spill] sm:$0xff] %v2917_v43  ;;  %v2922_v12 = vld [vmem:[%s2562_s19 + $0x2b0] sm:$0xff]  }
  0x49   : > { %1246 = vmatmul.mubr.bf16.vlgmr.msra.gmra.mxu0 %v2610_v35  ;;  %3426 = vst [vmem:[#allocation35_spill] sm:$0xff] %v2922_v12  ;;  %v2926_v35 = vld [vmem:[%s2562_s19 + $0x268] sm:$0xff]  }
  0x4a   : > { %1286 = vmatmul.mubr.bf16.vlgmr.msra.gmra.mxu1 %v2612_v36  ;;  %2051 = vmatpush3.bf16.msra.mxu0 %v2903_v15  ;;  %3428 = vst [vmem:[#allocation36_spill] sm:$0xff] %v2926_v35  ;;  %v2930_v36 = vld [vmem:[%s2562_s19 + $0x228] sm:$0xff]   ;;  %v2949_v15 = vld [vmem:[%s2562_s19 + $0x2a0] sm:$0xff]  }
  0x4b   : > { %2320 = vmatpush3.bf16.msra.mxu1 %v2908_v26  ;;  %2052 = vmatprep.subr.bf16.mxu0 %v2912_v38  ;;  %3429 = vst [vmem:[#allocation37_spill] sm:$0xff] %v2930_v36  ;;  %v2936_v38 = vld [vmem:[%s2562_s19 + $0x2a8] sm:$0xff]   ;;  %v2941_v26 = vld [vmem:[%s2562_s19 + $0x260] sm:$0xff]   ;;  %3433 = vst [vmem:[#allocation41_spill] sm:$0xff] %v2949_v15 }
  0x4c   : > { %2321 = vmatprep.subr.bf16.mxu1 %v3427_v14  ;;  %1325 = vmatprep.mubr.bf16.mxu0 %v2648_v59  ;;  %3430 = vst [vmem:[#allocation38_spill] sm:$0xff] %v2936_v38  ;;  %3431 = vst [vmem:[#allocation39_spill] sm:$0xff] %v2941_v26  ;;  %v2945_v59 = vld [vmem:[%s2562_s19 + $0x220] sm:$0xff]  }
  0x4d   : > { %2335 = vmatprep.mubr.msk.bf16.mxu1 %vm2515_vm0, %v3427_v14  ;;  %3432 = vst [vmem:[#allocation40_spill] sm:$0xff] %v2945_v59 }
  0x4e   : > { %2053 = vmatpush3.bf16.msra.mxu0 %v2917_v43  ;;  %v2962_v43 = vld [vmem:[%s2562_s19 + $0x298] sm:$0xff]  }
  0x4f   : > { %2322 = vmatpush3.bf16.msra.mxu1 %v2922_v12  ;;  %2054 = vmatprep.subr.bf16.mxu0 %v2926_v35  ;;  %v2954_v12 = vld [vmem:[%s2562_s19 + $0x258] sm:$0xff]  }
  0x50   : > { %2323 = vmatprep.subr.bf16.mxu1 %v3427_v14  ;;  %3434 = vst [vmem:[#allocation42_spill] sm:$0xff] %v2954_v12  ;;  %v2958_v35 = vld [vmem:[%s2562_s19 + $0x218] sm:$0xff]  }
  0x51   : > { %3435 = vst [vmem:[#allocation43_spill] sm:$0xff] %v2958_v35 }
  0x52   : > { %2055 = vmatpush3.bf16.msra.mxu0 %v2930_v36  ;;  %v2975_v36 = vld [vmem:[%s2562_s19 + $0x290] sm:$0xff]  }
  0x53   : > { %2324 = vmatpush3.bf16.msra.mxu1 %v2936_v38  ;;  %2056 = vmatprep.subr.bf16.mxu0 %v2941_v26  ;;  %v2967_v38 = vld [vmem:[%s2562_s19 + $0x250] sm:$0xff]   ;;  %3438 = vst [vmem:[#allocation46_spill] sm:$0xff] %v2975_v36 }
  0x54   : > { %2325 = vmatprep.subr.bf16.mxu1 %v3427_v14  ;;  %3436 = vst [vmem:[#allocation44_spill] sm:$0xff] %v2967_v38  ;;  %v2971_v26 = vld [vmem:[%s2562_s19 + $0x210] sm:$0xff]  }
  0x55   : > { %3437 = vst [vmem:[#allocation45_spill] sm:$0xff] %v2971_v26 }
  0x56   : > { %2057 = vmatpush3.bf16.msra.mxu0 %v2945_v59  ;;  %v2993_v59 = vld [vmem:[%s2562_s19 + $0x240] sm:$0xff]  }
  0x57   : > { %2326 = vmatpush3.bf16.msra.mxu1 %v2949_v15  ;;  %2058 = vmatprep.subr.bf16.mxu0 %v2954_v12  ;;  %v2980_v15 = vld [vmem:[%s2562_s19 + $0x248] sm:$0xff]   ;;  %3442 = vst [vmem:[#allocation50_spill] sm:$0xff] %v2993_v59 }
  0x58   : > { %2327 = vmatprep.subr.bf16.mxu1 %v3427_v14  ;;  %3439 = vst [vmem:[#allocation47_spill] sm:$0xff] %v2980_v15  ;;  %v2985_v12 = vld [vmem:[%s2562_s19 + $0x208] sm:$0xff]  }
  0x59   : > { %3440 = vst [vmem:[#allocation48_spill] sm:$0xff] %v2985_v12 }
  0x5a   : > { %2059 = vmatpush3.bf16.msra.mxu0 %v2958_v35  ;;  %v2990_v35 = vld [vmem:[%s2562_s19 + $0x288] sm:$0xff]  }
  0x5b   : > { %2328 = vmatpush3.bf16.msra.mxu1 %v2962_v43  ;;  %2060 = vmatprep.subr.bf16.mxu0 %v2967_v38  ;;  %3441 = vst [vmem:[#allocation49_spill] sm:$0xff] %v2990_v35  ;;  %v2998_v38 = vld [vmem:[%s2562_s19 + $0x200] sm:$0xff]  }
  0x5c   : > { %2329 = vmatprep.subr.bf16.mxu1 %v3427_v14  ;;  %3443 = vst [vmem:[#allocation51_spill] sm:$0xff] %v2998_v38 }
  0x5e   : > { %2061 = vmatpush3.bf16.msra.mxu0 %v2971_v26  ;;  %v3003_v26 = vld [vmem:[%s2562_s19 + $0x280] sm:$0xff]  }
  0x5f   : > { %2330 = vmatpush3.bf16.msra.mxu1 %v2975_v36  ;;  %2062 = vmatprep.subr.bf16.mxu0 %v2980_v15  ;;  %3444 = vst [vmem:[#allocation52_spill] sm:$0xff] %v3003_v26  ;;  %v380_v15 = vrot.slane %v2702_v45, %v2542_v6  ;;  %v388_v36 = vrot.slane %v2702_v45, %v2544_v7 }
  0x60   : > { %2331 = vmatprep.subr.bf16.mxu1 %v3427_v14 }
  0x62   : > { %2063 = vmatpush3.bf16.msra.mxu0 %v2985_v12 }
  0x63   : > { %2332 = vmatpush3.bf16.msra.mxu1 %v2990_v35  ;;  %2064 = vmatprep.subr.bf16.mxu0 %v2993_v59  ;;  %v3014_v35 = vpack.c.bf16 %v380_v15, %v380_v15  ;;  %v3017_v59 = vpack.c.bf16 %v388_v36, %v388_v36  ;;  %v376_v15 = vrot.slane %v2702_v45, %v2546_v8  ;;  %v3451_v36 = vld [vmem:[#allocation14_spill] sm:$0xff] }
  0x64   : > { %2333 = vmatprep.subr.bf16.mxu1 %v3427_v14 }
  0x66   : > { %2065 = vmatpush3.bf16.msra.mxu0 %v2998_v38 }
  0x67   : > { %2334 = vmatpush3.bf16.msra.mxu1 %v3003_v26  ;;  %2081 = vmatprep.subr.bf16.mxu0 %v2571_v16  ;;  %v384_v16 = vrot.slane %v2702_v45, %v2548_v9 }
  0x68   : > { %2103 = vmatprep.subr.bf16.mxu1 %v2582_v21  ;;  %v396_v21 = vrot.slane %v2702_v45, %v2553_v10 }
  0x69   : > { %1326 = vmatmul.mubr.bf16.vlgmr.msra.gmra.mxu0 %v2650_v60  ;;  %v3447_v60 = vld [vmem:[#allocation10_spill] sm:$0xff] }
  0x6a   : > { %2336 = vmatmul.mubr.bf16.vlgmr.msra.gmra.mxu1 %v2658_v1  ;;  %2082 = vmatpush3.bf16.msra.mxu0 %v2596_v27  ;;  %v3056_v27 = vpack.c.bf16 %v376_v15, %v376_v15  ;;  %v3449_v1 = vld [vmem:[#allocation12_spill] sm:$0xff]  ;;  %v3452_v15 = vld [vmem:[#allocation15_spill] sm:$0xff] }
  0x6b   : > { %2104 = vmatpush3.bf16.msra.mxu1 %v2604_v32  ;;  %2083 = vmatprep.subr.bf16.mxu0 %v2616_v37  ;;  %v404_v32 = vrot.slane %v2702_v45, %v2555_v11  ;;  %v3061_v37 = vpack.c.bf16 %v384_v16, %v384_v16  ;;  %v3453_v16 = vld [vmem:[#allocation16_spill] sm:$0xff] }
  0x6c   : > { %2105 = vmatprep.subr.bf16.mxu1 %v2622_v42  ;;  %1406 = vmatprep.mubr.bf16.mxu0 %v3014_v35  ;;  %v433_v42 = vpack.c.bf16 %v396_v21, %v396_v21  ;;  %v3454_v21 = vld [vmem:[#allocation17_spill] sm:$0xff] }
  0x6d   : > { %1446 = vmatprep.mubr.bf16.mxu1 %v3017_v59 }
  0x6e   : > { %2084 = vmatpush3.bf16.msra.mxu0 %v2630_v47  ;;  %v435_v47 = vpack.c.bf16 %v404_v32, %v404_v32  ;;  %v3455_v32 = vld [vmem:[#allocation18_spill] sm:$0xff] }
  0x6f   : > { %2106 = vmatpush3.bf16.msra.mxu1 %v2638_v52  ;;  %2085 = vmatprep.subr.bf16.mxu0 %v2644_v56  ;;  %v3445_v52 = vld [vmem:[#allocation8_spill] sm:$0xff]  ;;  %v3446_v56 = vld [vmem:[#allocation9_spill] sm:$0xff] }
  0x70   : > { %2107 = vmatprep.subr.bf16.mxu1 %v2654_v61  ;;  %v3448_v61 = vld [vmem:[#allocation11_spill] sm:$0xff] }
  0x72   : > { %2086 = vmatpush3.bf16.msra.mxu0 %v2662_v2  ;;  %v3450_v2 = vld [vmem:[#allocation13_spill] sm:$0xff] }
  0x73   : > { %2108 = vmatpush3.bf16.msra.mxu1 %v2668_v17  ;;  %2087 = vmatprep.subr.bf16.mxu0 %v2673_v20 }
  0x74   : > { %2109 = vmatprep.subr.bf16.mxu1 %v2678_v24 }
  0x76   : > { %2088 = vmatpush3.bf16.msra.mxu0 %v2684_v29 }
  0x77   : > { %2110 = vmatpush3.bf16.msra.mxu1 %v2689_v39  ;;  %2089 = vmatprep.subr.bf16.mxu0 %v2693_v41 }
  0x78   : > { %2111 = vmatprep.subr.bf16.mxu1 %v2699_v44 }
  0x7a   : > { %2090 = vmatpush3.bf16.msra.mxu0 %v2706_v46 }
  0x7b   : > { %2112 = vmatpush3.bf16.msra.mxu1 %v2710_v48  ;;  %2091 = vmatprep.subr.bf16.mxu0 %v2714_v49 }
  0x7c   : > { %2113 = vmatprep.subr.bf16.mxu1 %v2718_v13 }
  0x7e   : > { %2092 = vmatpush3.bf16.msra.mxu0 %v2722_v50 }
  0x7f   : > { %2114 = vmatpush3.bf16.msra.mxu1 %v2726_v51  ;;  %2093 = vmatprep.subr.bf16.mxu0 %v2730_v53 }
  0x80   : > { %2115 = vmatprep.subr.bf16.mxu1 %v2734_v54 }
  0x82   : > { %2094 = vmatpush3.bf16.msra.mxu0 %v2738_v55 }
  0x83   : > { %2116 = vmatpush3.bf16.msra.mxu1 %v2742_v57  ;;  %2095 = vmatprep.subr.bf16.mxu0 %v2746_v58 }
  0x84   : > { %2117 = vmatprep.subr.bf16.mxu1 %v2750_v62 }
  0x86   : > { %2096 = vmatpush3.bf16.msra.mxu0 %v2754_v63 }
  0x87   : > { %2118 = vmatpush3.bf16.msra.mxu1 %v2758_v3  ;;  %2125 = vmatprep.subr.bf16.mxu0 %v2762_v4 }
  0x88   : > { %2147 = vmatprep.subr.bf16.mxu1 %v2766_v5 }
  0x89   : > { %1407 = vmatmul.mubr.bf16.vlgmr.msra.gmra.mxu0 %v3056_v27 }
  0x8a   : > { %1447 = vmatmul.mubr.bf16.vlgmr.msra.gmra.mxu1 %v3061_v37  ;;  %2126 = vmatpush3.bf16.msra.mxu0 %v2770_v18 }
  0x8b   : > { %2148 = vmatpush3.bf16.msra.mxu1 %v2775_v19  ;;  %2127 = vmatprep.subr.bf16.mxu0 %v2780_v22 }
  0x8c   : > { %2149 = vmatprep.subr.bf16.mxu1 %v2784_v23  ;;  %1486 = vmatprep.mubr.bf16.mxu0 %v433_v42 }
  0x8d   : > { %1526 = vmatprep.mubr.bf16.mxu1 %v435_v47 }
  0x8e   : > { %2128 = vmatpush3.bf16.msra.mxu0 %v2789_v30 }
  0x8f   : > { %2150 = vmatpush3.bf16.msra.mxu1 %v2794_v31  ;;  %2129 = vmatprep.subr.bf16.mxu0 %v2798_v25 }
  0x90   : > { %2151 = vmatprep.subr.bf16.mxu1 %v2802_v33 }
  0x92   : > { %2130 = vmatpush3.bf16.msra.mxu0 %v3445_v52  ;;  %v3456_v52 = vld [vmem:[#allocation19_spill] sm:$0xff] }
  0x93   : > { %2152 = vmatpush3.bf16.msra.mxu1 %v3446_v56  ;;  %2131 = vmatprep.subr.bf16.mxu0 %v3447_v60  ;;  %v3457_v56 = vld [vmem:[#allocation20_spill] sm:$0xff]  ;;  %v3458_v60 = vld [vmem:[#allocation21_spill] sm:$0xff] }
  0x94   : > { %2153 = vmatprep.subr.bf16.mxu1 %v3448_v61  ;;  %v3459_v61 = vld [vmem:[#allocation22_spill] sm:$0xff] }
  0x96   : > { %2132 = vmatpush3.bf16.msra.mxu0 %v3449_v1  ;;  %v3460_v1 = vld [vmem:[#allocation23_spill] sm:$0xff] }
  0x97   : > { %2154 = vmatpush3.bf16.msra.mxu1 %v3450_v2  ;;  %2133 = vmatprep.subr.bf16.mxu0 %v3451_v36  ;;  %v3461_v2 = vld [vmem:[#allocation3_spill] sm:$0xff] }
  0x98   : > { %2155 = vmatprep.subr.bf16.mxu1 %v3452_v15  ;;  %v392_v36 = vrot.slane %v2702_v45, %v3461_v2  ;;  %v3463_v15 = vld [vmem:[#allocation25_spill] sm:$0xff] }
  0x9a   : > { %2134 = vmatpush3.bf16.msra.mxu0 %v3453_v16  ;;  %v3462_v16 = vld [vmem:[#allocation5_spill] sm:$0xff] }
  0x9b   : > { %2156 = vmatpush3.bf16.msra.mxu1 %v3454_v21  ;;  %2135 = vmatprep.subr.bf16.mxu0 %v3455_v32  ;;  %v400_v21 = vrot.slane %v2702_v45, %v3462_v16  ;;  %v441_v16 = vunpack.c.l.bf16 %v3061_v37  ;;  %v3466_v32 = vld [vmem:[#allocation30_spill] sm:$0xff]  ;;  %v3469_v37 = vld [vmem:[#allocation33_spill] sm:$0xff] }
  0x9c   : > { %2157 = vmatprep.subr.bf16.mxu1 %v3456_v52  ;;  %v439_v52 = vunpack.c.l.bf16 %v3056_v27  ;;  %v3468_v27 = vld [vmem:[#allocation32_spill] sm:$0xff] }
  0x9d   : > { %v434_v2 = vpack.c.bf16 %v400_v21, %v400_v21 }
  0x9e   : > { %2136 = vmatpush3.bf16.msra.mxu0 %v3457_v56 }
  0x9f   : > { %2158 = vmatpush3.bf16.msra.mxu1 %v3458_v60  ;;  %2137 = vmatprep.subr.bf16.mxu0 %v3459_v61  ;;  %v3464_v60 = vld [vmem:[#allocation28_spill] sm:$0xff]  ;;  %v432_v61 = vpack.c.bf16 %v392_v36, %v392_v36  ;;  %v445_v25 = vunpack.c.l.bf16 %v434_v2  ;;  %v3467_v36 = vld [vmem:[#allocation31_spill] sm:$0xff] }
  0xa0   : > { %2159 = vmatprep.subr.bf16.mxu1 %v3460_v1  ;;  %v412_v56 = vrot.slane %v3464_v60, %v2542_v6  ;;  %v440_v1 = vunpack.c.l.bf16 %v3014_v35 }
  0xa1   : > { %v443_v33 = vunpack.c.l.bf16 %v432_v61 }
  0xa2   : > { %2138 = vmatpush3.bf16.msra.mxu0 %v2870_v0  ;;  %v442_v0 = vunpack.c.l.bf16 %v3017_v59  ;;  %v3110_v35 = vpack.c.bf16 %v412_v56, %v412_v56  ;;  %v461_v59 = vcombine.low %v439_v52, %v440_v1  ;;  %v3471_v56 = vld [vmem:[#allocation35_spill] sm:$0xff]  ;;  %v3473_v52 = vld [vmem:[#allocation4_spill] sm:$0xff] }
  0xa3   : > { %2160 = vmatpush3.bf16.msra.mxu1 %v3463_v15  ;;  %2139 = vmatprep.subr.bf16.mxu0 %v2880_v28  ;;  %v3465_v15 = vld [vmem:[#allocation29_spill] sm:$0xff]  ;;  %v444_v28 = vunpack.c.l.bf16 %v433_v42 }
  0xa4   : > { %2161 = vmatprep.subr.bf16.mxu1 %v2884_v34  ;;  %v446_v34 = vunpack.c.l.bf16 %v435_v47  ;;  %v462_v21 = vcombine.low %v441_v16, %v442_v0  ;;  %v3470_v47 = vld [vmem:[#allocation34_spill] sm:$0xff]  ;;  %v471_v1 = vrot.slane %v461_v59, %v3473_v52  ;;  %v3478_v59 = vld [vmem:[#allocation41_spill] sm:$0xff] }
  0xa5   : > { %v463_v42 = vcombine.low %v443_v33, %v444_v28  ;;  %v3474_v33 = vld [vmem:[#allocation37_spill] sm:$0xff]  ;;  %v3475_v28 = vld [vmem:[#allocation38_spill] sm:$0xff] }
  0xa6   : > { %2140 = vmatpush3.bf16.msra.mxu0 %v2891_v40 }
  0xa7   : > { %2162 = vmatpush3.bf16.msra.mxu1 %v3465_v15  ;;  %2169 = vmatprep.subr.bf16.mxu0 %v3466_v32  ;;  %v464_v15 = vcombine.low %v445_v25, %v446_v34  ;;  %v485_v0 = vrot.slane %v463_v42, %v3473_v52  ;;  %v3476_v34 = vld [vmem:[#allocation39_spill] sm:$0xff] }
  0xa8   : > { %2339 = vmatprep.subr.bf16.mxu1 %v3427_v14 }
  0xa9   : > { %1487 = vmatmul.mubr.bf16.vlgmr.msra.gmra.mxu0 %v432_v61  ;;  %v3472_v61 = vld [vmem:[#allocation36_spill] sm:$0xff]  ;;  %v492_v25 = vrot.slane %v464_v15, %v3473_v52 }
  0xaa   : > { %1527 = vmatmul.mubr.bf16.vlgmr.msra.gmra.mxu1 %v434_v2  ;;  %2170 = vmatpush3.bf16.msra.mxu0 %v3467_v36  ;;  %v478_v2 = vrot.slane %v462_v21, %v3473_v52  ;;  %v3479_v21 = vld [vmem:[#allocation42_spill] sm:$0xff] }
  0xab   : > { %2340 = vmatpush3.bf16.msra.mxu1 %v3468_v27  ;;  %2171 = vmatprep.subr.bf16.mxu0 %v3469_v37 }
  0xac   : > { %2341 = vmatprep.subr.bf16.mxu1 %v3427_v14  ;;  %1566 = vmatprep.mubr.bf16.mxu0 %v3110_v35  ;;  %v493_v16 = vcombine.low %v471_v1, %v478_v2  ;;  %v3481_v1 = vld [vmem:[#allocation44_spill] sm:$0xff] }
  0xad   : > { %2355 = vmatprep.mubr.msk.bf16.mxu1 %vm2515_vm0, %v3427_v14 }
  0xae   : > { %2172 = vmatpush3.bf16.msra.mxu0 %v3470_v47  ;;  %v501_v15 = vrot.slane %v493_v16, %v3473_v52  ;;  %v408_v16 = vrot.slane %v3464_v60, %v2546_v8 }
  0xaf   : > { %2342 = vmatpush3.bf16.msra.mxu1 %v3471_v56  ;;  %2173 = vmatprep.subr.bf16.mxu0 %v3472_v61  ;;  %v494_v56 = vcombine.low %v485_v0, %v492_v25  ;;  %v3477_v61 = vld [vmem:[#allocation40_spill] sm:$0xff]  ;;  %v3482_v0 = vld [vmem:[#allocation45_spill] sm:$0xff]  ;;  %v3483_v25 = vld [vmem:[#allocation46_spill] sm:$0xff] }
  0xb0   : > { %2343 = vmatprep.subr.bf16.mxu1 %v3427_v14 }
  0xb1   : > { %v508_v42 = vrot.slane %v494_v56, %v3473_v52 }
  0xb2   : > { %2174 = vmatpush3.bf16.msra.mxu0 %v3474_v33  ;;  %v3480_v33 = vld [vmem:[#allocation43_spill] sm:$0xff] }
  0xb3   : > { %2344 = vmatpush3.bf16.msra.mxu1 %v3475_v28  ;;  %2175 = vmatprep.subr.bf16.mxu0 %v3476_v34  ;;  %v509_v2 = vcombine.low %v501_v15, %v508_v42  ;;  %v416_v15 = vrot.slane %v3464_v60, %v2548_v9  ;;  %v3485_v42 = vld [vmem:[#allocation49_spill] sm:$0xff] }
  0xb4   : > { %2345 = vmatprep.subr.bf16.mxu1 %v3427_v14 }
  0xb5   : > { %v3145_v56 = vsub.f32 %v2702_v45, %v509_v2  ;;  %v3158_v2 = vpack.c.bf16 %v408_v16, %v408_v16 }
  0xb6   : > { %2176 = vmatpush3.bf16.msra.mxu0 %v3477_v61 }
  0xb7   : > { %2346 = vmatpush3.bf16.msra.mxu1 %v3478_v59  ;;  %2177 = vmatprep.subr.bf16.mxu0 %v3479_v21  ;;  %v3484_v21 = vld [vmem:[#allocation47_spill] sm:$0xff]  ;;  %v546_v45 = vrot.slane %v3145_v56, %v2542_v6 }
  0xb8   : > { %2347 = vmatprep.subr.bf16.mxu1 %v3427_v14 }
  0xba   : > { %2178 = vmatpush3.bf16.msra.mxu0 %v3480_v33 }
  0xbb   : > { %2348 = vmatpush3.bf16.msra.mxu1 %v2962_v43  ;;  %2179 = vmatprep.subr.bf16.mxu0 %v3481_v1  ;;  %v2496_v1 = vld [vmem:[%s2562_s19 + $0x28] sm:$0xff]  }
  0xbc   : > { %2349 = vmatprep.subr.bf16.mxu1 %v3427_v14 }
  0xbe   : > { %2180 = vmatpush3.bf16.msra.mxu0 %v3482_v0  ;;  %v595_v0 = vpack.c.bf16 %v546_v45, %v546_v45  ;;  %v2493_v45 = vld [vmem:[%s2562_s19 + $0xb0] sm:$0xff]  }
  0xbf   : > { %2350 = vmatpush3.bf16.msra.mxu1 %v3483_v25  ;;  %2181 = vmatprep.subr.bf16.mxu0 %v3484_v21  ;;  %v3486_v25 = vld [vmem:[#allocation50_spill] sm:$0xff]  ;;  %v554_v21 = vrot.slane %v3145_v56, %v2544_v7  ;;  %v2488_v7 = vld [vmem:[%s2562_s19 + $0x38] sm:$0xff]  }
  0xc0   : > { %2351 = vmatprep.subr.bf16.mxu1 %v3427_v14 }
  0xc1   : > { %v597_v16 = vpack.c.bf16 %v554_v21, %v554_v21  ;;  %v2494_v21 = vld [vmem:[%s2562_s19 + $0x68] sm:$0xff]  }
  0xc2   : > { %2182 = vmatpush3.bf16.msra.mxu0 %v2985_v12  ;;  %v3163_v12 = vpack.c.bf16 %v416_v15, %v416_v15  ;;  %v2489_v15 = vld [vmem:[%s2562_s19 + $0xb8] sm:$0xff]  }
  0xc3   : > { %2352 = vmatpush3.bf16.msra.mxu1 %v3485_v42  ;;  %2183 = vmatprep.subr.bf16.mxu0 %v3486_v25  ;;  %v2486_v25 = vld [vmem:[%s2562_s19 + $0x78] sm:$0xff]  }
  0xc4   : > { %2353 = vmatprep.subr.bf16.mxu1 %v3427_v14  ;;  %v2487_v42 = vld [vmem:[%s2562_s19 + $0xf8] sm:$0xff]  }
  0xc6   : > { %2184 = vmatpush3.bf16.msra.mxu0 %v2998_v38  ;;  %v2495_v38 = vld [vmem:[%s2562_s19 + $0xe8] sm:$0xff]  }
  0xc7   : > { %2354 = vmatpush3.bf16.msra.mxu1 %v3003_v26  ;;  %2200 = vmatprep.subr.bf16.mxu0 %v2486_v25  ;;  %v2490_v26 = vld [vmem:[%s2562_s19 + $0x70] sm:$0xff]  }
  0xc8   : > { %2222 = vmatprep.subr.bf16.mxu1 %v2487_v42  ;;  %v2491_v25 = vld [vmem:[%s2562_s19 + $0xf0] sm:$0xff]  }
  0xc9   : > { %1567 = vmatmul.mubr.bf16.vlgmr.msra.gmra.mxu0 %v3158_v2  ;;  %v2492_v42 = vld [vmem:[%s2562_s19 + $0x30] sm:$0xff]  }
  0xca   : > { %2356 = vmatmul.mubr.bf16.vlgmr.msra.gmra.mxu1 %v3163_v12  ;;  %2201 = vmatpush3.bf16.msra.mxu0 %v2488_v7  ;;  %v3500_v7 = vld [vmem:[#allocation19_spill] sm:$0xff] }
  0xcb   : > { %2223 = vmatpush3.bf16.msra.mxu1 %v2489_v15  ;;  %2202 = vmatprep.subr.bf16.mxu0 %v2490_v26  ;;  %v3494_v26 = vld [vmem:[#allocation13_spill] sm:$0xff] }
  0xcc   : > { %2224 = vmatprep.subr.bf16.mxu1 %v2491_v25  ;;  %1647 = vmatprep.mubr.bf16.mxu0 %v595_v0  ;;  %v3497_v0 = vld [vmem:[#allocation16_spill] sm:$0xff] }
  0xcd   : > { %1687 = vmatprep.mubr.bf16.mxu1 %v597_v16  ;;  %v3499_v16 = vld [vmem:[#allocation18_spill] sm:$0xff]  ;;  %v3501_v25 = vld [vmem:[#allocation20_spill] sm:$0xff] }
  0xce   : > { %2203 = vmatpush3.bf16.msra.mxu0 %v2492_v42  ;;  %v3502_v42 = vld [vmem:[#allocation21_spill] sm:$0xff] }
  0xcf   : > { %2225 = vmatpush3.bf16.msra.mxu1 %v2493_v45  ;;  %2204 = vmatprep.subr.bf16.mxu0 %v2494_v21  ;;  %v3503_v45 = vld [vmem:[#allocation22_spill] sm:$0xff]  ;;  %v3504_v21 = vld [vmem:[#allocation23_spill] sm:$0xff] }
  0xd0   : > { %2226 = vmatprep.subr.bf16.mxu1 %v2495_v38  ;;  %v3493_v38 = vld [vmem:[#allocation12_spill] sm:$0xff] }
  0xd2   : > { %2205 = vmatpush3.bf16.msra.mxu0 %v2496_v1 }
  0xd3   : > { %2227 = vmatpush3.bf16.msra.mxu1 %v2668_v17  ;;  %2206 = vmatprep.subr.bf16.mxu0 %v2673_v20  ;;  %v542_v17 = vrot.slane %v3145_v56, %v2546_v8  ;;  %v550_v20 = vrot.slane %v3145_v56, %v2548_v9 }
  0xd4   : > { %2228 = vmatprep.subr.bf16.mxu1 %v2678_v24  ;;  %v562_v24 = vrot.slane %v3145_v56, %v2553_v10 }
  0xd6   : > { %2207 = vmatpush3.bf16.msra.mxu0 %v2684_v29  ;;  %v594_v29 = vpack.c.bf16 %v542_v17, %v542_v17 }
  0xd7   : > { %2229 = vmatpush3.bf16.msra.mxu1 %v2689_v39  ;;  %2208 = vmatprep.subr.bf16.mxu0 %v2693_v41  ;;  %v570_v39 = vrot.slane %v3145_v56, %v2555_v11  ;;  %v596_v41 = vpack.c.bf16 %v550_v20, %v550_v20  ;;  %v448_v11 = vunpack.c.l.bf16 %v3110_v35  ;;  %v3496_v35 = vld [vmem:[#allocation15_spill] sm:$0xff] }
  0xd8   : > { %2230 = vmatprep.subr.bf16.mxu1 %v2699_v44  ;;  %v599_v44 = vpack.c.bf16 %v562_v24, %v562_v24  ;;  %v3505_v20 = vld [vmem:[#allocation3_spill] sm:$0xff] }
  0xd9   : > { %v558_v24 = vrot.slane %v3145_v56, %v3505_v20 }
  0xda   : > { %2209 = vmatpush3.bf16.msra.mxu0 %v2706_v46 }
  0xdb   : > { %2231 = vmatpush3.bf16.msra.mxu1 %v2710_v48  ;;  %2210 = vmatprep.subr.bf16.mxu0 %v2714_v49  ;;  %v601_v48 = vpack.c.bf16 %v570_v39, %v570_v39  ;;  %v3507_v39 = vld [vmem:[#allocation5_spill] sm:$0xff] }
  0xdc   : > { %2232 = vmatprep.subr.bf16.mxu1 %v2718_v13  ;;  %v447_v13 = vunpack.c.l.bf16 %v3158_v2  ;;  %v3498_v2 = vld [vmem:[#allocation17_spill] sm:$0xff] }
  0xde   : > { %2211 = vmatpush3.bf16.msra.mxu0 %v2722_v50 }
  0xdf   : > { %2233 = vmatpush3.bf16.msra.mxu1 %v2726_v51  ;;  %2212 = vmatprep.subr.bf16.mxu0 %v2730_v53 }
  0xe0   : > { %2234 = vmatprep.subr.bf16.mxu1 %v2734_v54 }
  0xe2   : > { %2213 = vmatpush3.bf16.msra.mxu0 %v2738_v55 }
  0xe3   : > { %2235 = vmatpush3.bf16.msra.mxu1 %v2742_v57  ;;  %2214 = vmatprep.subr.bf16.mxu0 %v2746_v58 }
  0xe4   : > { %2236 = vmatprep.subr.bf16.mxu1 %v2750_v62  ;;  %v3487_v62 = vld [vmem:[#allocation6_spill] sm:$0xff] }
  0xe6   : > { %2215 = vmatpush3.bf16.msra.mxu0 %v2754_v63  ;;  %v510_v63 = vcombine.low %v447_v13, %v448_v11 }
  0xe7   : > { %2237 = vmatpush3.bf16.msra.mxu1 %v2758_v3  ;;  %2244 = vmatprep.subr.bf16.mxu0 %v2762_v4  ;;  %v449_v3 = vunpack.c.l.bf16 %v3163_v12  ;;  %v3495_v12 = vld [vmem:[#allocation14_spill] sm:$0xff] }
  0xe8   : > { %2266 = vmatprep.subr.bf16.mxu1 %v2766_v5  ;;  %v3488_v5 = vld [vmem:[#allocation7_spill] sm:$0xff] }
  0xe9   : > { %v1978_v46 = vpop.f32.mrf.mxu0  ;;  %1648 = vmatmul.mubr.bf16.vlgmr.msra.gmra.mxu0 %v594_v29  ;;  %v3506_v29 = vld [vmem:[#allocation24_spill] sm:$0xff] }
  0xea   : > { %v2000_v49 = vpop.f32.mrf.mxu1  ;;  %1688 = vmatmul.mubr.bf16.vlgmr.msra.gmra.mxu1 %v596_v41  ;;  %2245 = vmatpush3.bf16.msra.mxu0 %v2770_v18  ;;  %v3489_v18 = vld [vmem:[#allocation8_spill] sm:$0xff]  ;;  %v566_v41 = vrot.slane %v3145_v56, %v3507_v39 }
  0xeb   : > { %2267 = vmatpush3.bf16.msra.mxu1 %v2775_v19  ;;  %v1979_v10 = vpop.f32.mrf.mxu0  ;;  %2246 = vmatprep.subr.bf16.mxu0 %v2780_v22  ;;  %v3490_v19 = vld [vmem:[#allocation9_spill] sm:$0xff]  ;;  %v3491_v22 = vld [vmem:[#allocation10_spill] sm:$0xff] }
  0xec   : > { %v1980_v50 = vadd.f32 %v1979_v10, %v1978_v46  ;;  %v2001_v51 = vpop.f32.mrf.mxu1  ;;  %2268 = vmatprep.subr.bf16.mxu1 %v2784_v23  ;;  %1727 = vmatprep.mubr.bf16.mxu0 %v599_v44  ;;  %v517_v23 = vrot.slane %v510_v63, %v3473_v52  ;;  %v3508_v44 = vld [vmem:[#allocation25_spill] sm:$0xff]  ;;  %v3510_v46 = vld [vmem:[#allocation27_spill] sm:$0xff] }
  0xed   : > { %v2002_v53 = vadd.f32 %v2001_v51, %v2000_v49  ;;  %v1981_v54 = vpop.f32.mrf.mxu0  ;;  %1767 = vmatprep.mubr.bf16.mxu1 %v601_v48  ;;  %v598_v49 = vpack.c.bf16 %v558_v24, %v558_v24  ;;  %v3511_v10 = vld [vmem:[#allocation29_spill] sm:$0xff]  ;;  %v3519_v63 = vld [vmem:[#allocation47_spill] sm:$0xff] }
  0xee   : > { %v2003_v55 = vpop.f32.mrf.mxu1  ;;  %2247 = vmatpush3.bf16.msra.mxu0 %v2789_v30  ;;  %v524_v30 = vrot.slane %v449_v3, %v3473_v52  ;;  %v3521_v3 = vld [vmem:[#allocation49_spill] sm:$0xff] }
  0xef   : > { %v1208_v57 = vadd.f32 %v2002_v53, %v1980_v50  ;;  %2269 = vmatpush3.bf16.msra.mxu1 %v2794_v31  ;;  %v1982_v58 = vpop.f32.mrf.mxu0  ;;  %2248 = vmatprep.subr.bf16.mxu0 %v3487_v62  ;;  %v3492_v31 = vld [vmem:[#allocation11_spill] sm:$0xff]  ;;  %v3513_v55 = vld [vmem:[#allocation36_spill] sm:$0xff]  ;;  %v3514_v62 = vld [vmem:[#allocation37_spill] sm:$0xff] }
  0xf0   : > { %v2004_v4 = vpop.f32.mrf.mxu1  ;;  %2270 = vmatprep.subr.bf16.mxu1 %v3488_v5  ;;  %v525_v1 = vcombine.low %v517_v23, %v524_v30  ;;  %v3523_v5 = vld [vmem:[#allocation51_spill] sm:$0xff] }
  0xf2   : > { %2249 = vmatpush3.bf16.msra.mxu0 %v3489_v18  ;;  %v532_v15 = vrot.slane %v525_v1, %v3473_v52  ;;  %v3509_v52 = vld [vmem:[#allocation26_spill] sm:$0xff] }
  0xf3   : > { %2271 = vmatpush3.bf16.msra.mxu1 %v3490_v19  ;;  %2250 = vmatprep.subr.bf16.mxu0 %v3491_v22  ;;  %v3524_v19 = vld [vmem:[#allocation52_spill] sm:$0xff] }
  0xf4   : > { %2272 = vmatprep.subr.bf16.mxu1 %v3492_v31  ;;  %v536_v17 = vsub.f32 %v3464_v60, %v532_v15  ;;  %v600_v60 = vpack.c.bf16 %v566_v41, %v566_v41 }
  0xf6   : > { %2251 = vmatpush3.bf16.msra.mxu0 %v3493_v38  ;;  %v578_v48 = vrot.slane %v536_v17, %v2542_v6 }
  0xf7   : > { %2273 = vmatpush3.bf16.msra.mxu1 %v3494_v26  ;;  %2252 = vmatprep.subr.bf16.mxu0 %v3495_v12 }
  0xf8   : > { %2274 = vmatprep.subr.bf16.mxu1 %v3496_v35  ;;  %v603_v11 = vpack.c.bf16 %v578_v48, %v578_v48 }
  0xfa   : > { %2253 = vmatpush3.bf16.msra.mxu0 %v3497_v0 }
  0xfb   : > { %2275 = vmatpush3.bf16.msra.mxu1 %v3498_v2  ;;  %2254 = vmatprep.subr.bf16.mxu0 %v3499_v16 }
  0xfc   : > { %2276 = vmatprep.subr.bf16.mxu1 %v3500_v7 }
  0xfe   : > { %2255 = vmatpush3.bf16.msra.mxu0 %v3501_v25 }
  0xff   : > { %2277 = vmatpush3.bf16.msra.mxu1 %v3502_v42  ;;  %2256 = vmatprep.subr.bf16.mxu0 %v3503_v45 }
 0x100   : > { %2278 = vmatprep.subr.bf16.mxu1 %v3504_v21 }
 0x102   : > { %2257 = vmatpush3.bf16.msra.mxu0 %v3506_v29 }
 0x103   : > { %2279 = vmatpush3.bf16.msra.mxu1 %v3508_v44  ;;  %2258 = vmatprep.subr.bf16.mxu0 %v3509_v52 }
 0x104   : > { %2280 = vmatprep.subr.bf16.mxu1 %v3510_v46 }
 0x106   : > { %2259 = vmatpush3.bf16.msra.mxu0 %v2891_v40 }
 0x107   : > { %2281 = vmatpush3.bf16.msra.mxu1 %v3511_v10  ;;  %2288 = vmatprep.subr.bf16.mxu0 %v3466_v32 }
 0x108   : > { %2359 = vmatprep.subr.bf16.mxu1 %v3427_v14 }
 0x109   : > { %v2022_v56 = vpop.f32.mrf.mxu0  ;;  %1728 = vmatmul.mubr.bf16.vlgmr.msra.gmra.mxu0 %v598_v49 }
 0x10a   : > { %v2044_v13 = vpop.f32.mrf.mxu1  ;;  %1768 = vmatmul.mubr.bf16.vlgmr.msra.gmra.mxu1 %v600_v60  ;;  %2289 = vmatpush3.bf16.msra.mxu0 %v3467_v36  ;;  %v3512_v36 = vld [vmem:[#allocation35_spill] sm:$0xff] }
 0x10b   : > { %2360 = vmatpush3.bf16.msra.mxu1 %v3468_v27  ;;  %v2023_v6 = vpop.f32.mrf.mxu0  ;;  %2290 = vmatprep.subr.bf16.mxu0 %v3469_v37 }
 0x10c   : > { %v2024_v40 = vadd.f32 %v2023_v6, %v2022_v56  ;;  %v2045_v50 = vpop.f32.mrf.mxu1  ;;  %2361 = vmatprep.subr.bf16.mxu1 %v3427_v14  ;;  %1807 = vmatprep.mubr.bf16.mxu0 %v603_v11 }
 0x10d   : > { %v2046_v32 = vadd.f32 %v2045_v50, %v2044_v13  ;;  %v2025_v51 = vpop.f32.mrf.mxu0  ;;  %2375 = vmatprep.mubr.msk.bf16.mxu1 %vm2515_vm0, %v3427_v14 }
 0x10e   : > { %v1248_v53 = vadd.f32 %v2024_v40, %v1208_v57  ;;  %v2047_v54 = vpop.f32.mrf.mxu1  ;;  %2291 = vmatpush3.bf16.msra.mxu0 %v3470_v47  ;;  %v3515_v47 = vld [vmem:[#allocation42_spill] sm:$0xff]  ;;  %v3516_v57 = vld [vmem:[#allocation44_spill] sm:$0xff] }
 0x10f   : > { %2362 = vmatpush3.bf16.msra.mxu1 %v3512_v36  ;;  %v2026_v27 = vpop.f32.mrf.mxu0  ;;  %2292 = vmatprep.subr.bf16.mxu0 %v3513_v55  ;;  %v3525_v54 = vld [vmem:[#allocation2_spill] sm:$0xff] }
 0x110   : > { %v1288_v37 = vadd.f32 %v2046_v32, %v1248_v53  ;;  %v2048_v58 = vpop.f32.mrf.mxu1  ;;  %2363 = vmatprep.subr.bf16.mxu1 %v3427_v14 }
 0x112   : > { %2293 = vmatpush3.bf16.msra.mxu0 %v3514_v62 }
 0x113   : > { %2364 = vmatpush3.bf16.msra.mxu1 %v3475_v28  ;;  %2294 = vmatprep.subr.bf16.mxu0 %v3476_v34  ;;  %v3517_v28 = vld [vmem:[#allocation45_spill] sm:$0xff]  ;;  %v3518_v34 = vld [vmem:[#allocation46_spill] sm:$0xff] }
 0x114   : > { %2365 = vmatprep.subr.bf16.mxu1 %v3427_v14 }
 0x116   : > { %2295 = vmatpush3.bf16.msra.mxu0 %v3477_v61  ;;  %v574_v61 = vrot.slane %v536_v17, %v2546_v8 }
 0x117   : > { %2366 = vmatpush3.bf16.msra.mxu1 %v3478_v59  ;;  %2296 = vmatprep.subr.bf16.mxu0 %v3515_v47  ;;  %v3520_v59 = vld [vmem:[#allocation48_spill] sm:$0xff] }
 0x118   : > { %2367 = vmatprep.subr.bf16.mxu1 %v3427_v14  ;;  %v602_v4 = vpack.c.bf16 %v574_v61, %v574_v61 }
 0x11a   : > { %2297 = vmatpush3.bf16.msra.mxu0 %v3480_v33  ;;  %v582_v33 = vrot.slane %v536_v17, %v2548_v9 }
 0x11b   : > { %2368 = vmatpush3.bf16.msra.mxu1 %v2962_v43  ;;  %2298 = vmatprep.subr.bf16.mxu0 %v3516_v57  ;;  %v3522_v43 = vld [vmem:[#allocation50_spill] sm:$0xff] }
 0x11c   : > { %2369 = vmatprep.subr.bf16.mxu1 %v3427_v14  ;;  %v604_v18 = vpack.c.bf16 %v582_v33, %v582_v33 }
 0x11e   : > { %2299 = vmatpush3.bf16.msra.mxu0 %v3517_v28 }
 0x11f   : > { %2370 = vmatpush3.bf16.msra.mxu1 %v3518_v34  ;;  %2300 = vmatprep.subr.bf16.mxu0 %v3519_v63 }
 0x120   : > { %2371 = vmatprep.subr.bf16.mxu1 %v3427_v14 }
 0x122   : > { %2301 = vmatpush3.bf16.msra.mxu0 %v3520_v59 }
 0x123   : > { %2372 = vmatpush3.bf16.msra.mxu1 %v3521_v3  ;;  %2302 = vmatprep.subr.bf16.mxu0 %v3522_v43 }
 0x124   : > { %2373 = vmatprep.subr.bf16.mxu1 %v3427_v14 }
 0x126   : > { %2303 = vmatpush3.bf16.msra.mxu0 %v3523_v5 }
 0x127   : > { %2374 = vmatpush3.bf16.msra.mxu1 %v3524_v19 }
 0x129   : > { %v2066_v22 = vpop.f32.mrf.mxu0  ;;  %1808 = vmatmul.mubr.bf16.vlgmr.msra.gmra.mxu0 %v602_v4 }
 0x12a   : > { %v1367_v23 = vpop.f32.mrf.mxu1  ;;  %2376 = vmatmul.mubr.bf16.vlgmr.msra.gmra.mxu1 %v604_v18 }
 0x12b   : > { %v2067_v8 = vpop.f32.mrf.mxu0 }
 0x12c   : > { %v2068_v30 = vadd.f32 %v2067_v8, %v2066_v22  ;;  %v2337_v31 = vpop.f32.mrf.mxu1 }
 0x12d   : > { %v2069_v9 = vpop.f32.mrf.mxu0 }
 0x12e   : > { %v1328_v38 = vadd.f32 %v2068_v30, %v1288_v37  ;;  %v1370_v26 = vpop.f32.mrf.mxu1 }
 0x12f   : > { %v2070_v12 = vpop.f32.mrf.mxu0 }
 0x130   : > { %v1368_v35 = vadd.f32 %v1367_v23, %v1328_v38  ;;  %v2338_v1 = vpop.f32.mrf.mxu1 }
 0x132   : > { %v1373_v36 = vadd.f32 %v3525_v54, %v1368_v35 }
 0x149   : > { %v2097_v14 = vpop.f32.mrf.mxu0 }
 0x14a   : > { %v2119_v0 = vpop.f32.mrf.mxu1 }
 0x14b   : > { %v2098_v2 = vpop.f32.mrf.mxu0 }
 0x14c   : > { %v2099_v16 = vadd.f32 %v2098_v2, %v2097_v14  ;;  %v2120_v7 = vpop.f32.mrf.mxu1 }
 0x14d   : > { %v2121_v15 = vadd.f32 %v2120_v7, %v2119_v0  ;;  %v2100_v25 = vpop.f32.mrf.mxu0 }
 0x14e   : > { %v2122_v42 = vpop.f32.mrf.mxu1 }
 0x14f   : > { %v1449_v45 = vadd.f32 %v2121_v15, %v2099_v16  ;;  %v2101_v21 = vpop.f32.mrf.mxu0 }
 0x150   : > { %v2123_v17 = vpop.f32.mrf.mxu1 }
 0x169   : > { %v2141_v20 = vpop.f32.mrf.mxu0 }
 0x16a   : > { %v2163_v24 = vpop.f32.mrf.mxu1 }
 0x16b   : > { %v2142_v29 = vpop.f32.mrf.mxu0 }
 0x16c   : > { %v2143_v39 = vadd.f32 %v2142_v29, %v2141_v20  ;;  %v2164_v41 = vpop.f32.mrf.mxu1 }
 0x16d   : > { %v2165_v44 = vadd.f32 %v2164_v41, %v2163_v24  ;;  %v2144_v52 = vpop.f32.mrf.mxu0 }
 0x16e   : > { %v1489_v46 = vadd.f32 %v2143_v39, %v1449_v45  ;;  %v2166_v48 = vpop.f32.mrf.mxu1 }
 0x16f   : > { %v2145_v49 = vpop.f32.mrf.mxu0 }
 0x170   : > { %v1529_v60 = vadd.f32 %v2165_v44, %v1489_v46  ;;  %v2167_v10 = vpop.f32.mrf.mxu1 }
 0x189   : > { %v2185_v11 = vpop.f32.mrf.mxu0 }
 0x18a   : > { %v1608_v56 = vpop.f32.mrf.mxu1 }
 0x18b   : > { %v2186_v13 = vpop.f32.mrf.mxu0 }
 0x18c   : > { %v2187_v6 = vadd.f32 %v2186_v13, %v2185_v11  ;;  %v2357_v40 = vpop.f32.mrf.mxu1 }
 0x18d   : > { %v2188_v50 = vpop.f32.mrf.mxu0 }
 0x18e   : > { %v1569_v32 = vadd.f32 %v2187_v6, %v1529_v60  ;;  %v1611_v51 = vpop.f32.mrf.mxu1 }
 0x18f   : > { %v2189_v53 = vpop.f32.mrf.mxu0 }
 0x190   : > { %v1609_v27 = vadd.f32 %v1608_v56, %v1569_v32  ;;  %v2358_v55 = vpop.f32.mrf.mxu1 }
 0x192   : > { %v1614_v37 = vadd.f32 %v1609_v27, %v1373_v36 }
 0x1a9   : > { %v2216_v58 = vpop.f32.mrf.mxu0 }
 0x1aa   : > { %v2238_v62 = vpop.f32.mrf.mxu1 }
 0x1ab   : > { %v2217_v47 = vpop.f32.mrf.mxu0 }
 0x1ac   : > { %v2239_v57 = vpop.f32.mrf.mxu1  ;;  %v2218_v22 = vadd.f32 %v2217_v47, %v2216_v58 }
 0x1ad   : > { %v2219_v28 = vpop.f32.mrf.mxu0  ;;  %v2240_v23 = vadd.f32 %v2239_v57, %v2238_v62 }
 0x1ae   : > { %v2241_v34 = vpop.f32.mrf.mxu1 }
 0x1af   : > { %v2220_v63 = vpop.f32.mrf.mxu0  ;;  %v1690_v30 = vadd.f32 %v2240_v23, %v2218_v22 }
 0x1b0   : > { %v2242_v61 = vpop.f32.mrf.mxu1 }
 0x1c9   : > { %v2260_v59 = vpop.f32.mrf.mxu0 }
 0x1ca   : > { %v2282_v33 = vpop.f32.mrf.mxu1 }
 0x1cb   : > { %v2261_v3 = vpop.f32.mrf.mxu0 }
 0x1cc   : > { %v2283_v43 = vpop.f32.mrf.mxu1  ;;  %v2262_v8 = vadd.f32 %v2261_v3, %v2260_v59 }
 0x1cd   : > { %v2263_v4 = vpop.f32.mrf.mxu0  ;;  %v2284_v9 = vadd.f32 %v2283_v43, %v2282_v33 }
 0x1ce   : > { %v2285_v5 = vpop.f32.mrf.mxu1  ;;  %v1730_v31 = vadd.f32 %v2262_v8, %v1690_v30 }
 0x1cf   : > { %v2264_v18 = vpop.f32.mrf.mxu0 }
 0x1d0   : > { %v2286_v19 = vpop.f32.mrf.mxu1  ;;  %v1770_v35 = vadd.f32 %v2284_v9, %v1730_v31 }
 0x1e9   : > { %v2304_v38 = vpop.f32.mrf.mxu0 }
 0x1ea   : > { %v1849_v26 = vpop.f32.mrf.mxu1 }
 0x1eb   : > { %v2305_v12 = vpop.f32.mrf.mxu0 }
 0x1ec   : > { %v2306_v1 = vadd.f32 %v2305_v12, %v2304_v38  ;;  %v2377_v14 = vpop.f32.mrf.mxu1 }
 0x1ed   : > { %v2307_v0 = vpop.f32.mrf.mxu0 }
 0x1ee   : > { %v1810_v2 = vadd.f32 %v2306_v1, %v1770_v35  ;;  %v1852_v16 = vpop.f32.mrf.mxu1 }
 0x1ef   : > { %v2308_v7 = vpop.f32.mrf.mxu0 }
 0x1f0   : > { %v1850_v15 = vadd.f32 %v1849_v26, %v1810_v2  ;;  %v2378_v25 = vpop.f32.mrf.mxu1  ;;  %16 = sbr.rel (!%p14_p0) target bundleno = 1 (0x1), region = 37 }
 0x1f2   : > { %v1855_v42 = vadd.f32 %v1850_v15, %v1614_v37  }
 0x1f4   : > { %v3526_v0 = vmov %v1855_v42  ;;  %v1856_v45 = vmul.f32 (%p14_p0), 2.0, %v1855_v42 }
 0x1f6   :  { %1857 = vst [vmem:[%s3299_s2] sm:$0x1] %v1856_v45 }

</bundles_post_ra>
